<compile_context>
chip_gen: v5e
topology: v5e:2x2
jax: 0.10.0
libtpu: 0.0.40
codegen_flags: <defaults>
</compile_context>

<pallas_src>
import functools

import jax
import jax.numpy as jnp
import numpy as np
from jax.experimental import pallas as pl
from jax.experimental.pallas import tpu as pltpu

EPS = 1e-3  # L1_Charbonnier default


def _edge_loss_kernel(x_ref, y_ref, out_ref, carry_ref, *, eps, H, W, TH, ragged):
    """Row-tile kernel.

    x_ref, y_ref : (1, 3, TH, W) row tiles of X and Y (any float dtype).
    out_ref      : (1, 8, 128)   per-sample f32 accumulator tile (lane dense).
    carry_ref    : (2, W-2)      f32 seam carry from the previous row tile:
                     row 0 = 9*g[last] - h3[last-1] - h3[last]
                             (partial lap of the next tile's first seam row)
                     row 1 = h3[last] (needed by the next tile's second seam row)
    """
    h = pl.program_id(1)
    Wm = W - 2
    eps2 = eps * eps

    @pl.when(h == 0)
    def _():
        out_ref[...] = jnp.zeros_like(out_ref)

    # --- gray(X - Y): gray conversion and the 3x3 conv are both linear, so
    #     diff first -> ONE gray + ONE laplacian. ----------------------------
    def chan_diff(c):
        return x_ref[0, c].astype(jnp.float32) - y_ref[0, c].astype(jnp.float32)

    g = 0.299 * chan_diff(0) + 0.587 * chan_diff(1) + 0.114 * chan_diff(2)  # (TH, W)

    # Separable 3x3 box sum: horizontal 3-sum once per input row.
    h3 = g[:, 0:Wm] + g[:, 1:W - 1] + g[:, 2:W]     # (TH, Wm)
    gc = g[:, 1:W - 1]                              # center columns (TH, Wm)

    # --- Bulk output rows owned by this tile ---------------------------------
    # Local input row i in [2, TH) -> global VALID-conv output row
    # r = h*TH + (i - 2); everything it needs lives inside this tile.
    lap = 9.0 * gc[1:TH - 1, :] - (h3[0:TH - 2, :] + h3[1:TH - 1, :] + h3[2:TH, :])
    err = jnp.sqrt(lap * lap + eps2)                # (TH-2, Wm)
    if ragged:
        # Only the last (partial) tile has rows past the image; validity
        # depends on the row only, so mask after the lane reduce (cheap).
        row_sum = jnp.sum(err, axis=1, keepdims=True)                       # (TH-2, 1)
        r = jax.lax.broadcasted_iota(jnp.int32, (TH - 2, 1), 0) + h * TH
        bulk = jnp.sum(jnp.where(r <= H - 3, row_sum, 0.0))
    else:
        bulk = jnp.sum(err)
    out_ref[...] = out_ref[...] + bulk

    # --- Seam rows r0 = h*TH - 2 and r1 = h*TH - 1 ----------------------------
    # They straddle the previous tile; assemble them from the carried partials.
    # Skipped entirely at h == 0, so the carry is never read uninitialized.
    @pl.when(h > 0)
    def _():
        lap0 = carry_ref[0:1, :] - h3[0:1, :]
        lap1 = 9.0 * gc[0:1, :] - (carry_ref[1:2, :] + h3[0:1, :] + h3[1:2, :])
        err0 = jnp.sqrt(lap0 * lap0 + eps2)
        err1 = jnp.sqrt(lap1 * lap1 + eps2)
        s = jnp.sum(err0)
        if ragged:
            s = s + jnp.where(h * TH - 1 <= H - 3, jnp.sum(err1), 0.0)
        else:
            s = s + jnp.sum(err1)
        out_ref[...] = out_ref[...] + s

    # --- Carry for the next row tile of this sample (written AFTER the seam
    #     read above).  Harmless extra write on the last tile / batch seam. ----
    carry_ref[0:1, :] = 9.0 * gc[TH - 1:TH, :] - (h3[TH - 2:TH - 1, :] + h3[TH - 1:TH, :])
    carry_ref[1:2, :] = h3[TH - 1:TH, :]


def _vmem_limit_bytes():
    """Explicit scoped-VMEM limit, derived from the chip when possible."""
    cap = None
    try:
        info = pltpu.get_tpu_info()
        cap = int(getattr(info, "vmem_capacity_bytes", 0)) or None
    except Exception:
        cap = None
    if cap is None:
        cap = 64 * 1024 * 1024  # assume the smallest (v7x-class) VMEM
    # Leave headroom for the compiler; never ask for more than 100 MiB.
    return int(min(max(cap - (16 << 20), 32 << 20), 100 << 20))


def _choose_tile_h(H, W, itemsize, ws_budget_bytes):
    """Largest row tile (multiple of 8, or the whole image) whose estimated
    working set — 2 inputs x 2 pipeline buffers of (3, TH, W) plus ~8 f32
    temporaries of (TH, W) — stays under ws_budget_bytes."""
    per_row = 2 * 2 * 3 * W * itemsize + 8 * W * 4
    max_th = max(8, int(ws_budget_bytes // per_row))
    if H <= max_th:
        return H
    return (max_th // 8) * 8


def edge_loss(X, Y, eps=EPS, tile_h=None):
    """Pallas implementation of Edge_loss.forward(X, Y).  X, Y: (N, 3, H, W)."""
    N, C, H, W = X.shape
    assert C == 3, "Edge_loss expects RGB (C=3) inputs"
    assert H >= 3 and W >= 3, "VALID 3x3 conv needs H >= 3 and W >= 3"
    assert Y.shape == X.shape

    vmem_limit = _vmem_limit_bytes()
    itemsize = jnp.dtype(X.dtype).itemsize
    if tile_h is not None:
        TH = int(tile_h)
    else:
        TH = _choose_tile_h(H, W, itemsize, int(0.7 * vmem_limit))
    TH = min(TH, H)
    assert TH >= 3, (H, TH)
    nH = pl.cdiv(H, TH)
    ragged = (H % TH) != 0

    partials = pl.pallas_call(
        functools.partial(_edge_loss_kernel, eps=float(eps), H=H, W=W, TH=TH,
                          ragged=ragged),
        out_shape=jax.ShapeDtypeStruct((N, 8, 128), jnp.float32),
        grid=(N, nH),
        in_specs=[
            pl.BlockSpec((1, 3, TH, W), lambda b, h: (b, 0, h, 0)),
            pl.BlockSpec((1, 3, TH, W), lambda b, h: (b, 0, h, 0)),
        ],
        out_specs=pl.BlockSpec((1, 8, 128), lambda b, h: (b, 0, 0)),
        scratch_shapes=[pltpu.VMEM((2, W - 2), jnp.float32)],
        compiler_params=pltpu.CompilerParams(
            dimension_semantics=("parallel", "arbitrary"),
            vmem_limit_bytes=vmem_limit),
    )(X, Y)

    count = N * (H - 2) * (W - 2)  # mean over the VALID-conv edge maps
    return jnp.sum(partials[:, 0, 0]) / count


def _reference(X, Y, eps=EPS):
    """Pure-JAX reference matching the PyTorch module."""
    def gray(img):
        return 0.299 * img[:, 0] + 0.587 * img[:, 1] + 0.114 * img[:, 2]

    k = jnp.array([[-1., -1., -1.], [-1., 8., -1.], [-1., -1., -1.]],
                  jnp.float32).reshape(1, 1, 3, 3)

    def lap(g):
        return jax.lax.conv_general_dilated(
            g[:, None, :, :], k, window_strides=(1, 1), padding="VALID")[:, 0]

    ex = lap(gray(X.astype(jnp.float32)))
    ey = lap(gray(Y.astype(jnp.float32)))
    d = ex - ey
    return jnp.mean(jnp.sqrt(d * d + eps * eps))


if __name__ == "__main__":
    keys = jax.random.split(jax.random.PRNGKey(0), 6)

    # Case 1: single row tile per sample (TH == H).
    X = jax.random.uniform(keys[0], (2, 3, 16, 16), dtype=jnp.float32)
    Y = jax.random.uniform(keys[1], (2, 3, 16, 16), dtype=jnp.float32)
    loss = jax.block_until_ready(edge_loss(X, Y))
    ref = jax.block_until_ready(_reference(X, Y))
    assert np.allclose(np.asarray(loss), np.asarray(ref),
                       rtol=1e-5, atol=1e-6), (loss, ref)

    # Case 2: force H-tiling (3 row tiles, exercises the 2-row seam carry).
    X2 = jax.random.uniform(keys[2], (2, 3, 24, 16), dtype=jnp.float32)
    Y2 = jax.random.uniform(keys[3], (2, 3, 24, 16), dtype=jnp.float32)
    loss2 = jax.block_until_ready(edge_loss(X2, Y2, tile_h=8))
    ref2 = jax.block_until_ready(_reference(X2, Y2))
    assert np.allclose(np.asarray(loss2), np.asarray(ref2),
                       rtol=1e-5, atol=1e-6), (loss2, ref2)

    # Case 3: ragged H (20 rows, tile 8 -> 3 tiles, last one partial + masked).
    X3 = jax.random.uniform(keys[4], (2, 3, 20, 16), dtype=jnp.float32)
    Y3 = jax.random.uniform(keys[5], (2, 3, 20, 16), dtype=jnp.float32)
    loss3 = jax.block_until_ready(edge_loss(X3, Y3, tile_h=8))
    ref3 = jax.block_until_ready(_reference(X3, Y3))
    assert np.allclose(np.asarray(loss3), np.asarray(ref3),
                       rtol=1e-5, atol=1e-6), (loss3, ref3)

    print("KERNEL_OK")
</pallas_src>

<mosaic_0001>
module attributes {stable_mosaic.version = 11 : i64} {
  func.func @_edge_loss_kernel(%arg0: i32, %arg1: i32, %arg2: memref<1x3x16x16xf32, #tpu.memory_space<vmem>>, %arg3: memref<1x3x16x16xf32, #tpu.memory_space<vmem>>, %arg4: memref<1x8x128xf32, #tpu.memory_space<vmem>>, %arg5: memref<2x14xf32, #tpu.memory_space<vmem>>) attributes {dimension_semantics = [#tpu.dimension_semantics<parallel>, #tpu.dimension_semantics<arbitrary>], iteration_bounds = array<i64: 2, 1>, scalar_prefetch = 0 : i64, scratch_operands = 1 : i64, tpu.core_type = #tpu.core_type<tc>, window_params = [{transform_indices = @transform_0, window_bounds = array<i64: 1, 3, 16, 16>}, {transform_indices = @transform_1, window_bounds = array<i64: 1, 3, 16, 16>}, {transform_indices = @transform_2, window_bounds = array<i64: 1, 8, 128>}]} {
    %c0_i32 = arith.constant 0 : i32
    %0 = arith.cmpi eq, %arg1, %c0_i32 : i32
    %1 = arith.extui %0 : i1 to i32
    %c0_i32_0 = arith.constant 0 : i32
    %2 = arith.cmpi ne, %1, %c0_i32_0 : i32
    scf.if %2 {
      %cst_40 = arith.constant 0.000000e+00 : f32
      %66 = vector.broadcast %cst_40 : f32 to vector<1x8x128xf32>
      %c0_41 = arith.constant 0 : index
      %c0_42 = arith.constant 0 : index
      %c0_43 = arith.constant 0 : index
      %67 = vector.load %arg4[%c0_41, %c0_42, %c0_43] : memref<1x8x128xf32, #tpu.memory_space<vmem>>, vector<1x8x128xf32>
      tpu.vector_store %arg4[%c0_41, %c0_42, %c0_43], %66 {strides = array<i32>} : memref<1x8x128xf32, #tpu.memory_space<vmem>>, vector<1x8x128xf32>,
    } else {
    }
    %c0 = arith.constant 0 : index
    %c0_1 = arith.constant 0 : index
    %c0_2 = arith.constant 0 : index
    %c0_3 = arith.constant 0 : index
    %3 = vector.load %arg2[%c0, %c0_1, %c0_2, %c0_3] : memref<1x3x16x16xf32, #tpu.memory_space<vmem>>, vector<1x1x16x16xf32>
    %4 = vector.shape_cast %3 : vector<1x1x16x16xf32> to vector<16x16xf32>
    %c0_4 = arith.constant 0 : index
    %c0_5 = arith.constant 0 : index
    %c0_6 = arith.constant 0 : index
    %c0_7 = arith.constant 0 : index
    %5 = vector.load %arg3[%c0_4, %c0_5, %c0_6, %c0_7] : memref<1x3x16x16xf32, #tpu.memory_space<vmem>>, vector<1x1x16x16xf32>
    %6 = vector.shape_cast %5 : vector<1x1x16x16xf32> to vector<16x16xf32>
    %7 = arith.subf %4, %6 : vector<16x16xf32>
    %cst = arith.constant 2.990000e-01 : f32
    %8 = vector.broadcast %cst : f32 to vector<16x16xf32>
    %9 = arith.mulf %8, %7 : vector<16x16xf32>
    %c0_8 = arith.constant 0 : index
    %c1 = arith.constant 1 : index
    %c0_9 = arith.constant 0 : index
    %c0_10 = arith.constant 0 : index
    %10 = vector.load %arg2[%c0_8, %c1, %c0_9, %c0_10] : memref<1x3x16x16xf32, #tpu.memory_space<vmem>>, vector<1x1x16x16xf32>
    %11 = vector.shape_cast %10 : vector<1x1x16x16xf32> to vector<16x16xf32>
    %c0_11 = arith.constant 0 : index
    %c1_12 = arith.constant 1 : index
    %c0_13 = arith.constant 0 : index
    %c0_14 = arith.constant 0 : index
    %12 = vector.load %arg3[%c0_11, %c1_12, %c0_13, %c0_14] : memref<1x3x16x16xf32, #tpu.memory_space<vmem>>, vector<1x1x16x16xf32>
    %13 = vector.shape_cast %12 : vector<1x1x16x16xf32> to vector<16x16xf32>
    %14 = arith.subf %11, %13 : vector<16x16xf32>
    %cst_15 = arith.constant 5.870000e-01 : f32
    %15 = vector.broadcast %cst_15 : f32 to vector<16x16xf32>
    %16 = arith.mulf %15, %14 : vector<16x16xf32>
    %17 = arith.addf %9, %16 : vector<16x16xf32>
    %c0_16 = arith.constant 0 : index
    %c2 = arith.constant 2 : index
    %c0_17 = arith.constant 0 : index
    %c0_18 = arith.constant 0 : index
    %18 = vector.load %arg2[%c0_16, %c2, %c0_17, %c0_18] : memref<1x3x16x16xf32, #tpu.memory_space<vmem>>, vector<1x1x16x16xf32>
    %19 = vector.shape_cast %18 : vector<1x1x16x16xf32> to vector<16x16xf32>
    %c0_19 = arith.constant 0 : index
    %c2_20 = arith.constant 2 : index
    %c0_21 = arith.constant 0 : index
    %c0_22 = arith.constant 0 : index
    %20 = vector.load %arg3[%c0_19, %c2_20, %c0_21, %c0_22] : memref<1x3x16x16xf32, #tpu.memory_space<vmem>>, vector<1x1x16x16xf32>
    %21 = vector.shape_cast %20 : vector<1x1x16x16xf32> to vector<16x16xf32>
    %22 = arith.subf %19, %21 : vector<16x16xf32>
    %cst_23 = arith.constant 1.140000e-01 : f32
    %23 = vector.broadcast %cst_23 : f32 to vector<16x16xf32>
    %24 = arith.mulf %23, %22 : vector<16x16xf32>
    %25 = arith.addf %17, %24 : vector<16x16xf32>
    %26 = vector.extract_strided_slice %25 {offsets = [0, 0], sizes = [16, 14], strides = [1, 1]} : vector<16x16xf32> to vector<16x14xf32>
    %27 = vector.extract_strided_slice %25 {offsets = [0, 1], sizes = [16, 14], strides = [1, 1]} : vector<16x16xf32> to vector<16x14xf32>
    %28 = arith.addf %26, %27 : vector<16x14xf32>
    %29 = vector.extract_strided_slice %25 {offsets = [0, 2], sizes = [16, 14], strides = [1, 1]} : vector<16x16xf32> to vector<16x14xf32>
    %30 = arith.addf %28, %29 : vector<16x14xf32>
    %31 = vector.extract_strided_slice %25 {offsets = [0, 1], sizes = [16, 14], strides = [1, 1]} : vector<16x16xf32> to vector<16x14xf32>
    %32 = vector.extract_strided_slice %31 {offsets = [1, 0], sizes = [14, 14], strides = [1, 1]} : vector<16x14xf32> to vector<14x14xf32>
    %cst_24 = arith.constant 9.000000e+00 : f32
    %33 = vector.broadcast %cst_24 : f32 to vector<14x14xf32>
    %34 = arith.mulf %33, %32 : vector<14x14xf32>
    %35 = vector.extract_strided_slice %30 {offsets = [0, 0], sizes = [14, 14], strides = [1, 1]} : vector<16x14xf32> to vector<14x14xf32>
    %36 = vector.extract_strided_slice %30 {offsets = [1, 0], sizes = [14, 14], strides = [1, 1]} : vector<16x14xf32> to vector<14x14xf32>
    %37 = arith.addf %35, %36 : vector<14x14xf32>
    %38 = vector.extract_strided_slice %30 {offsets = [2, 0], sizes = [14, 14], strides = [1, 1]} : vector<16x14xf32> to vector<14x14xf32>
    %39 = arith.addf %37, %38 : vector<14x14xf32>
    %40 = arith.subf %34, %39 : vector<14x14xf32>
    %41 = arith.mulf %40, %40 : vector<14x14xf32>
    %cst_25 = arith.constant 9.99999997E-7 : f32
    %42 = vector.broadcast %cst_25 : f32 to vector<14x14xf32>
    %43 = arith.addf %41, %42 : vector<14x14xf32>
    %44 = math.sqrt %43 : vector<14x14xf32>
    %45 = vector.shape_cast %44 : vector<14x14xf32> to vector<1x14x14xf32>
    %cst_26 = arith.constant dense<0.000000e+00> : vector<1xf32>
    %46 = vector.multi_reduction <add>, %45, %cst_26 [1, 2] : vector<1x14x14xf32> to vector<1xf32>
    %47 = vector.shape_cast %46 : vector<1xf32> to vector<1x1x1xf32>
    %48 = vector.extract %47[0, 0, 0] : f32 from vector<1x1x1xf32>
    %c0_27 = arith.constant 0 : index
    %c0_28 = arith.constant 0 : index
    %c0_29 = arith.constant 0 : index
    %49 = vector.load %arg4[%c0_27, %c0_28, %c0_29] : memref<1x8x128xf32, #tpu.memory_space<vmem>>, vector<1x8x128xf32>
    %50 = vector.broadcast %48 : f32 to vector<1x8x128xf32>
    %51 = arith.addf %49, %50 : vector<1x8x128xf32>
    %c0_30 = arith.constant 0 : index
    %c0_31 = arith.constant 0 : index
    %c0_32 = arith.constant 0 : index
    %52 = vector.load %arg4[%c0_30, %c0_31, %c0_32] : memref<1x8x128xf32, #tpu.memory_space<vmem>>, vector<1x8x128xf32>
    tpu.vector_store %arg4[%c0_30, %c0_31, %c0_32], %51 {strides = array<i32>} : memref<1x8x128xf32, #tpu.memory_space<vmem>>, vector<1x8x128xf32>,
    %c0_i32_33 = arith.constant 0 : i32
    %53 = arith.cmpi sgt, %arg1, %c0_i32_33 : i32
    %54 = arith.extui %53 : i1 to i32
    %c0_i32_34 = arith.constant 0 : i32
    %55 = arith.cmpi ne, %54, %c0_i32_34 : i32
    scf.if %55 {
      %c0_40 = arith.constant 0 : index
      %c0_41 = arith.constant 0 : index
      %66 = vector.load %arg5[%c0_40, %c0_41] : memref<2x14xf32, #tpu.memory_space<vmem>>, vector<1x14xf32>
      %67 = vector.extract_strided_slice %30 {offsets = [0, 0], sizes = [1, 14], strides = [1, 1]} : vector<16x14xf32> to vector<1x14xf32>
      %68 = arith.subf %66, %67 : vector<1x14xf32>
      %69 = vector.extract_strided_slice %31 {offsets = [0, 0], sizes = [1, 14], strides = [1, 1]} : vector<16x14xf32> to vector<1x14xf32>
      %cst_42 = arith.constant 9.000000e+00 : f32
      %70 = vector.broadcast %cst_42 : f32 to vector<1x14xf32>
      %71 = arith.mulf %70, %69 : vector<1x14xf32>
      %c1_43 = arith.constant 1 : index
      %c0_44 = arith.constant 0 : index
      %72 = vector.load %arg5[%c1_43, %c0_44] : memref<2x14xf32, #tpu.memory_space<vmem>>, vector<1x14xf32>
      %73 = vector.extract_strided_slice %30 {offsets = [0, 0], sizes = [1, 14], strides = [1, 1]} : vector<16x14xf32> to vector<1x14xf32>
      %74 = arith.addf %72, %73 : vector<1x14xf32>
      %75 = vector.extract_strided_slice %30 {offsets = [1, 0], sizes = [1, 14], strides = [1, 1]} : vector<16x14xf32> to vector<1x14xf32>
      %76 = arith.addf %74, %75 : vector<1x14xf32>
      %77 = arith.subf %71, %76 : vector<1x14xf32>
      %78 = arith.mulf %68, %68 : vector<1x14xf32>
      %cst_45 = arith.constant 9.99999997E-7 : f32
      %79 = vector.broadcast %cst_45 : f32 to vector<1x14xf32>
      %80 = arith.addf %78, %79 : vector<1x14xf32>
      %81 = math.sqrt %80 : vector<1x14xf32>
      %82 = arith.mulf %77, %77 : vector<1x14xf32>
      %cst_46 = arith.constant 9.99999997E-7 : f32
      %83 = vector.broadcast %cst_46 : f32 to vector<1x14xf32>
      %84 = arith.addf %82, %83 : vector<1x14xf32>
      %85 = math.sqrt %84 : vector<1x14xf32>
      %86 = vector.shape_cast %81 : vector<1x14xf32> to vector<1x1x14xf32>
      %cst_47 = arith.constant dense<0.000000e+00> : vector<1xf32>
      %87 = vector.multi_reduction <add>, %86, %cst_47 [1, 2] : vector<1x1x14xf32> to vector<1xf32>
      %88 = vector.shape_cast %87 : vector<1xf32> to vector<1x1x1xf32>
      %89 = vector.extract %88[0, 0, 0] : f32 from vector<1x1x1xf32>
      %90 = vector.shape_cast %85 : vector<1x14xf32> to vector<1x1x14xf32>
      %cst_48 = arith.constant dense<0.000000e+00> : vector<1xf32>
      %91 = vector.multi_reduction <add>, %90, %cst_48 [1, 2] : vector<1x1x14xf32> to vector<1xf32>
      %92 = vector.shape_cast %91 : vector<1xf32> to vector<1x1x1xf32>
      %93 = vector.extract %92[0, 0, 0] : f32 from vector<1x1x1xf32>
      %94 = arith.addf %89, %93 : f32
      %c0_49 = arith.constant 0 : index
      %c0_50 = arith.constant 0 : index
      %c0_51 = arith.constant 0 : index
      %95 = vector.load %arg4[%c0_49, %c0_50, %c0_51] : memref<1x8x128xf32, #tpu.memory_space<vmem>>, vector<1x8x128xf32>
      %96 = vector.broadcast %94 : f32 to vector<1x8x128xf32>
      %97 = arith.addf %95, %96 : vector<1x8x128xf32>
      %c0_52 = arith.constant 0 : index
      %c0_53 = arith.constant 0 : index
      %c0_54 = arith.constant 0 : index
      %98 = vector.load %arg4[%c0_52, %c0_53, %c0_54] : memref<1x8x128xf32, #tpu.memory_space<vmem>>, vector<1x8x128xf32>
      tpu.vector_store %arg4[%c0_52, %c0_53, %c0_54], %97 {strides = array<i32>} : memref<1x8x128xf32, #tpu.memory_space<vmem>>, vector<1x8x128xf32>,
    } else {
    }
    %56 = vector.extract_strided_slice %31 {offsets = [15, 0], sizes = [1, 14], strides = [1, 1]} : vector<16x14xf32> to vector<1x14xf32>
    %cst_35 = arith.constant 9.000000e+00 : f32
    %57 = vector.broadcast %cst_35 : f32 to vector<1x14xf32>
    %58 = arith.mulf %57, %56 : vector<1x14xf32>
    %59 = vector.extract_strided_slice %30 {offsets = [14, 0], sizes = [1, 14], strides = [1, 1]} : vector<16x14xf32> to vector<1x14xf32>
    %60 = vector.extract_strided_slice %30 {offsets = [15, 0], sizes = [1, 14], strides = [1, 1]} : vector<16x14xf32> to vector<1x14xf32>
    %61 = arith.addf %59, %60 : vector<1x14xf32>
    %62 = arith.subf %58, %61 : vector<1x14xf32>
    %c0_36 = arith.constant 0 : index
    %c0_37 = arith.constant 0 : index
    %63 = vector.load %arg5[%c0_36, %c0_37] : memref<2x14xf32, #tpu.memory_space<vmem>>, vector<1x14xf32>
    tpu.vector_store %arg5[%c0_36, %c0_37], %62 {strides = array<i32>} : memref<2x14xf32, #tpu.memory_space<vmem>>, vector<1x14xf32>,
    %64 = vector.extract_strided_slice %30 {offsets = [15, 0], sizes = [1, 14], strides = [1, 1]} : vector<16x14xf32> to vector<1x14xf32>
    %c1_38 = arith.constant 1 : index
    %c0_39 = arith.constant 0 : index
    %65 = vector.load %arg5[%c1_38, %c0_39] : memref<2x14xf32, #tpu.memory_space<vmem>>, vector<1x14xf32>
    tpu.vector_store %arg5[%c1_38, %c0_39], %64 {strides = array<i32>} : memref<2x14xf32, #tpu.memory_space<vmem>>, vector<1x14xf32>,
    return
  }
  func.func @transform_0(%arg0: i32, %arg1: i32) -> (i32, i32, i32, i32) {
    %c0_i32 = arith.constant 0 : i32
    %c0_i32_0 = arith.constant 0 : i32
    %c0_i32_1 = arith.constant 0 : i32
    return %arg0, %c0_i32, %arg1, %c0_i32_0 : i32, i32, i32, i32
  }
  func.func @transform_1(%arg0: i32, %arg1: i32) -> (i32, i32, i32, i32) {
    %c0_i32 = arith.constant 0 : i32
    %c0_i32_0 = arith.constant 0 : i32
    %c0_i32_1 = arith.constant 0 : i32
    return %arg0, %c0_i32, %arg1, %c0_i32_0 : i32, i32, i32, i32
  }
  func.func @transform_2(%arg0: i32, %arg1: i32) -> (i32, i32, i32) {
    %c0_i32 = arith.constant 0 : i32
    %c0_i32_0 = arith.constant 0 : i32
    %c0_i32_1 = arith.constant 0 : i32
    return %arg0, %c0_i32, %c0_i32_0 : i32, i32, i32
  }
}

</mosaic_0001>

<bundles_post_ra>
// kernel: tpu_custom_call.1
= control target key start
LH: loop header
LB: loop body
LE: loop exit
PB: predicated region body
PF: predicated region fallthrough
CT: control target
= control target key end

     0   :  { %7 = vsyncpa [#allocation4], 0  ;;  %s1007_s0 = inlined_call_operand.hbm [shape: f32[2,3,16,16], index: 0, kind: input, shape index: {}]   ;;  %s1008_s1 = inlined_call_operand.hbm [shape: f32[2,3,16,16], index: 1, kind: input, shape index: {}]   ;;  %s1009_s2 = inlined_call_operand.hbm [shape: f32[2,8,128], index: 2, kind: output, shape index: {}]  }
   0x1   :  { %9 = vsyncpa [#allocation4 + $0x1], 0 }
   0x2   :  { %10 = vsyncpa [#allocation7], 0 }
   0x3   :  { %12 = vsyncpa [#allocation7 + $0x1], 0 }
   0x4   :  { %13 = vsyncpa [#allocation5], 0 }
   0x5   :  { %15 = vsyncpa [#allocation5 + $0x1], 0  ;;  %s855_s9 = smov 0   ;;  %s857_s10 = smov 0  }
   0x6   :  { %s859_s11 = smov 0   ;;  %s861_s12 = smov 0  }
   0x7   :  { %s863_s13 = smov 0   ;;  %s865_s14 = smov 0  }
   0x8 LB: > { %s583_s15 = sadd.s32 4294967295, %s833_s14   ;;  %s584_s16 = sadd.s32 4294967294, %s833_s14   ;;  %s833_s14 = sphi %s865_s14, %s21_s14   ;;  %s829_s13 = sphi %s863_s13, %s1019_s13   ;;  %s825_s12 = sphi %s861_s12, %s1018_s12   ;;  %s821_s11 = sphi %s859_s11, %s1017_s11   ;;  %s817_s10 = sphi %s857_s10, %s1016_s10   ;;  %s813_s9 = sphi %s855_s9, %s1015_s9  }
   0x9   : > { %s33_s17 = sadd.s32 1, %s829_s13  ;;  %s42_s18 = sadd.s32 1, %s821_s11 }
   0xa   : > { %p35_p0 = scmp.ge.s32.totalorder %s33_s17, 2  ;;  %p49_p1 = scmp.ne.s32.totalorder %s821_s11, %s817_s10 }
   0xb   : > { %p50_p2 = scmp.eq.s32.totalorder %s833_s14, 0  ;;  %p55_p3 = scmp.ne.s32.totalorder %s817_s10, %s813_s9 }
   0xc   : > { %s1021_s17 = smov (%p35_p0, %s33_s17), 0  ;;  %p56_p5 = scmp.eq.s32.totalorder %s583_s15, 0 }
   0xd   : > { %p896_p4 = por %p50_p2, %p49_p1  ;;  %s37_s20 = ssub.s32 %s829_s13, %s1021_s17 }
   0xe   : > { %p107_p6 = scmp.eq.s32.totalorder %s583_s15, 1  ;;  %p40_p7 = scmp.eq.s32.totalorder %s37_s20, 0 }
   0xf   : > { %p902_p8 = por %p56_p5, %p55_p3  ;;  %p113_p10 = scmp.eq.s32.totalorder %s584_s16, 1 }
  0x10   : > { %p906_p9 = por %p107_p6, %p49_p1  ;;  %p586_p12 = scmp.ge.s32.totalorder %s833_s14, 2 }
  0x11   : > { %s911_s23 = scalar_select %p40_p7, %s821_s11, %s42_s18  }
  0x12   : > { %p913_p11 = por %p113_p10, %p55_p3  ;;  %p627_p13 = scmp.lt.s32.totalorder %s833_s14, 2 }
  0x13   : > { %s920_s25 = sand.u32 1, %s821_s11   ;;  %s604_s27 = smul.u32 48, %s829_s13 }
  0x14   : > { %s603_s26 = smul.u32 48, %s920_s25  ;;  %p926_p0 = pnand %p627_p13, %p896_p4 }
  0x15   : > { %s144_s3 = scalar_lea.hbm %s1007_s0, %s604_s27  ;;  %p589_p1 = scmp.ge.s32.totalorder %s833_s14, 1 }
  0x16   : > { %s137_s4 = scalar_lea.vmem [#allocation3], %s603_s26  ;;  %s145_s6 = sshll.u32 %s144_s3, 4  ;;  %s146_s6 = int_to_ptr.hbm [resolvable:$true] %s145_s6 }
  0x17   : > { %s147_s5 = sshll.u32 %s137_s4, 4  ;;  %s134_s7 = scalar_lea.sflag [#allocation4], %s920_s25  ;;  %s148_s5 = int_to_ptr.vmem [resolvable:$true] %s147_s5 }
  0x18   : > { %s835_s8 = smov 128   ;;  %s836_s15 = smov 8  }
  0x19   : > { %619 = dma.hbm_to_vmem [thread:$0]  (!%p926_p0), %s146_s6, 768, %s148_s5, %s134_s7, %s835_s8, %s835_s8, %s836_s15  }
  0x1a   : > { %p179_p2 = scmp.lt.s32.totalorder %s833_s14, 3  ;;  %s168_s19 = scalar_lea.hbm %s1008_s1, %s604_s27 }
  0x1b   : > { %s169_s20 = sshll.u32 %s168_s19, 4  ;;  %s161_s29 = scalar_lea.vmem [#allocation6], %s603_s26  ;;  %s170_s20 = int_to_ptr.hbm [resolvable:$true] %s169_s20 }
  0x1c   : > { %p180_p3 = pnand %p589_p1, %p179_p2  ;;  %s171_s30 = sshll.u32 %s161_s29, 4  ;;  %s172_s30 = int_to_ptr.vmem [resolvable:$true] %s171_s30 }
  0x1d   : > { %s158_s3 = scalar_lea.sflag [#allocation7], %s920_s25  ;;  %s945_s4 = sand.u32 (!%p180_p3), 1, %s817_s10  }
  0x1e   : > { %622 = dma.hbm_to_vmem [thread:$0]  (!%p926_p0), %s170_s20, 768, %s172_s30, %s158_s3, %s835_s8, %s835_s8, %s836_s15  }
  0x1f   : > { %183 = sbr.rel (%p180_p3) target bundleno = 614 (0x266), region = 28  ;;  %s186_s6 = scalar_lea.sflag (!%p180_p3), [#allocation4], %s945_s4 }
  0x20   : > { %s607_s5 = smul.u32 (!%p180_p3), 48, %s945_s4 }
  0x22   : > { %s189_s7 = scalar_lea.vmem (!%p180_p3), [#allocation3], %s607_s5 }
  0x24   : > { %800 = dma.done.wait (%p902_p8), %s186_s6, 768  }
  0x25   : > { %802 = vsyncadd (%p902_p8), %s186_s6, 4294966528  ;;  %s196_s25 = scalar_lea.sflag [#allocation7], %s945_s4  ;;  %s199_s26 = scalar_lea.vmem [#allocation6], %s607_s5 }
  0x26   : > { %804 = dma.done.wait (%p902_p8), %s196_s25, 768  }
  0x27   : > { %806 = vsyncadd (%p902_p8), %s196_s25, 4294966528  ;;  %v233_v0 = vld [vmem:[%s189_s7] sm:$0xff]  ;;  %v591_v2 = vld [vmem:[%s189_s7 + $0x10] sm:$0xff]  ;;  %s837_s21 = smov 127   ;;  %s838_s27 = smov 126   ;;  %vm287_vm0 = vcmask 1046528  }
  0x28   : > { %v235_v1 = vld [vmem:[%s199_s26] sm:$0xff]  ;;  %v593_v4 = vld [vmem:[%s199_s26 + $0x10] sm:$0xff]  ;;  %v234_v9 = vld [vmem:[%s189_s7 + $0x8] sm:$0xff]  ;;  %vm295_vm1 = vcmask 1045504   ;;  %s839_s28 = smov 1   ;;  %vm305_vm2 = vcmask 1040384  }
  0x29   : > { %v237_v3 = vsub.f32 %v233_v0, %v235_v1  ;;  %v595_v5 = vld [vmem:[%s189_s7 + $0x20] sm:$0xff]  ;;  %v247_v7 = vsub.f32 %v591_v2, %v593_v4  ;;  %v236_v10 = vld [vmem:[%s199_s26 + $0x8] sm:$0xff]  ;;  %v592_v11 = vld [vmem:[%s189_s7 + $0x18] sm:$0xff]  ;;  %vm358_vm7 = vcmask 111616   ;;  %vm356_vm8 = vcmask 113664   ;;  %s590_s8 = sshll.u32 %s945_s4, 3 }
  0x2a   : > { %v597_v6 = vld [vmem:[%s199_s26 + $0x20] sm:$0xff]  ;;  %v238_v13 = vsub.f32 %v234_v9, %v236_v10  ;;  %v594_v14 = vld [vmem:[%s199_s26 + $0x18] sm:$0xff]  ;;  %v596_v15 = vld [vmem:[%s189_s7 + $0x28] sm:$0xff]  ;;  %s600_s15 = sshll.u32 %s825_s12, 3  ;;  %s225_s20 = scalar_lea.vmem [#allocation8], %s590_s8 }
  0x2b   : > { %v259_v8 = vsub.f32 %v595_v5, %v597_v6  ;;  %v239_v12 = vmul.f32 0.299, %v237_v3  ;;  %v598_v16 = vld [vmem:[%s199_s26 + $0x28] sm:$0xff]  ;;  %v249_v17 = vmul.f32 0.587, %v247_v7  ;;  %v248_v19 = vsub.f32 %v592_v11, %v594_v14  ;;  %s471_s19 = scalar_lea.hbm %s1009_s2, %s600_s15  ;;  %s473_s29 = sshll.u32 %s225_s20, 4  ;;  %s474_s29 = int_to_ptr.vmem [resolvable:$true] %s473_s29 }
  0x2c   : > { %v240_v21 = vmul.f32 0.299, %v238_v13  ;;  %v260_v23 = vsub.f32 %v596_v15, %v598_v16  ;;  %s475_s30 = sshll.u32 %s471_s19, 4  ;;  %s461_s5 = scalar_lea.sflag [#allocation5], %s945_s4  ;;  %s476_s30 = int_to_ptr.hbm [resolvable:$true] %s475_s30 }
  0x2d   : > { %v261_v18 = vmul.f32 0.114, %v259_v8  ;;  %v251_v20 = vadd.f32 %v249_v17, %v239_v12  ;;  %v250_v22 = vmul.f32 0.587, %v248_v19  ;;  %s761_s6 = sshra.s32 %s476_s30, 4  ;;  %s767_s26 = scalar_lea.hbm %s1009_s2, 16  ;;  %s762_s6 = int_to_ptr.hbm [resolvable:$true] %s761_s6 }
  0x2e   : > { %v262_v26 = vmul.f32 0.114, %v260_v23  ;;  %s763_s7 = scalar_lea.hbm %s762_s6, 8  ;;  %p768_p7 = scmp.lt.s32.totalorder %s762_s6, %s1009_s2 }
  0x2f   : > { %v263_v24 = vadd.f32 %v261_v18, %v251_v20  ;;  %v252_v25 = vadd.f32 %v250_v22, %v240_v21  ;;  %p764_p4 = scmp.ne.s32.totalorder %s762_s6, %s763_s7  ;;  %p769_p8 = scmp.lt.s32.totalorder %s767_s26, %s763_s7 }
  0x31   : > { %267 = vrot.lane.b32.xlu0 %v263_v24, %s837_s21  ;;  %275 = vrot.lane.b32.xlu1 %v263_v24, %s838_s27  ;;  %v264_v27 = vadd.f32 %v262_v26, %v252_v25  ;;  %v283_v49 = vmul.f32 9.0, %v263_v24  ;;  %p765_p5 = pnand %p764_p4, %p906_p9  ;;  %p770_p10 = por %p769_p8, %p768_p7 }
  0x33   : > { %v284_v54 = vmul.f32 9.0, %v264_v27  ;;  %p766_p6 = pneg %p765_p5 }
  0x35   : > { %p771_p13 = pnand %p770_p10, %p766_p6 }
  0x39   : > { %269 = vrot.lane.b32.xlu0 %v264_v27, %s837_s21  ;;  %277 = vrot.lane.b32.xlu1 %v264_v27, %s838_s27 }
  0xa3   : > { %v268_v28 = vpop.permute.xlu0 %267  ;;  %v276_v29 = vpop.permute.xlu1 %275 }
  0xa4   : > { %v273_v30 = vadd.f32 %v268_v28, %v263_v24 }
  0xa6   : > { %v281_v33 = vadd.f32 %v276_v29, %v273_v30 }
  0xa8   : > { %v288_v36 = vrot.slane %v281_v33, 1  ;;  %v296_v39 = vrot.slane %v281_v33, 2 }
  0xab   : > { %v270_v31 = vpop.permute.xlu0 %269  ;;  %v278_v32 = vpop.permute.xlu1 %277 }
  0xac   : > { %v274_v34 = vadd.f32 %v270_v31, %v264_v27 }
  0xae   : > { %v282_v35 = vadd.f32 %v278_v32, %v274_v34 }
  0xb0   : > { %v289_v37 = vrot.slane %v282_v35, 1  ;;  %v297_v38 = vrot.slane %v282_v35, 2 }
  0xb2   : > { %v290_v40 = vsel %vm287_vm0, %v288_v36, %v289_v37  ;;  %v294_v42 = vadd.f32 %v289_v37, %v282_v35  ;;  %v298_v43 = vsel %vm295_vm1, %v296_v39, %v297_v38 }
  0xb3   : > { %v293_v41 = vadd.f32 %v290_v40, %v281_v33 }
  0xb4   : > { %v302_v46 = vadd.f32 %v297_v38, %v294_v42  ;;  %v448_v18 = vrot.slane %v294_v42, 7 }
  0xb5   : > { %v301_v44 = vadd.f32 %v298_v43, %v293_v41 }
  0xb6   : > { %v307_v47 = vrot.slane %v302_v46, 7 }
  0xb7   : > { %v306_v45 = vrot.slane %v301_v44, 7 }
  0xb9   : > { %309 = vrot.lane.b32.xlu2 %v306_v45, %s839_s28  ;;  %v308_v48 = vsel %vm305_vm2, %v306_v45, %v307_v47 }
  0xc1   : > { %311 = vrot.lane.b32.xlu2 %v308_v48, %s839_s28 }
 0x113   : > { %v310_v50 = vpop.permute.xlu2 %309 }
 0x114   : > { %v315_v51 = vsub.f32 %v283_v49, %v310_v50 }
 0x116   : > { %v317_v52 = vmul.f32 %v315_v51, %v315_v51 }
 0x118   : > { %v319_v53 = vadd.f32 1e-06, %v317_v52 }
 0x11a   : > { %683 = vrsqrt.f32 %v319_v53  ;;  %vm328_vm3 = vcmp.eq.f32.partialorder %v319_v53, inf  ;;  %v331_v9 = vand.u32 2147483648, %v319_v53  ;;  %vm330_vm4 = vcmp.eq.f32.partialorder %v319_v53, 0.0 }
 0x11b   : > { %v312_v55 = vpop.permute.xlu2 %311 }
 0x11c   : > { %v316_v56 = vsub.f32 %v284_v54, %v312_v55 }
 0x11e   : > { %v318_v57 = vmul.f32 %v316_v56, %v316_v56 }
 0x120   : > { %v684_v58 = vpop.eup %683  ;;  %v320_v59 = vadd.f32 1e-06, %v318_v57 }
 0x121   : > { %v322_v60 = vmul.f32 %v684_v58, %v319_v53 }
 0x122   : > { %685 = vrsqrt.f32 %v320_v59  ;;  %vm340_vm5 = vcmp.eq.f32.partialorder %v320_v59, inf  ;;  %v343_v11 = vand.u32 2147483648, %v320_v59  ;;  %vm342_vm6 = vcmp.eq.f32.partialorder %v320_v59, 0.0 }
 0x123   : > { %v323_v61 = vmul.f32 %v684_v58, %v322_v60 }
 0x125   : > { %v324_v62 = vmul.f32 0.5, %v323_v61 }
 0x127   : > { %v325_v63 = vsub.f32 1.5, %v324_v62 }
 0x128   : > { %v686_v0 = vpop.eup %685 }
 0x129   : > { %v334_v1 = vmul.f32 %v686_v0, %v320_v59  ;;  %v326_v2 = vmul.f32 %v684_v58, %v325_v63 }
 0x12b   : > { %v335_v3 = vmul.f32 %v686_v0, %v334_v1  ;;  %v327_v5 = vmul.f32 %v326_v2, %v319_v53 }
 0x12d   : > { %v336_v4 = vmul.f32 0.5, %v335_v3  ;;  %v329_v8 = vsel %vm328_vm3, %v319_v53, %v327_v5 }
 0x12e   : > { %v332_v12 = vsel %vm330_vm4, %v331_v9, %v329_v8 }
 0x12f   : > { %v337_v6 = vsub.f32 1.5, %v336_v4  ;;  %v347_v16 = vrot.slane %v332_v12, 1 }
 0x131   : > { %v338_v7 = vmul.f32 %v686_v0, %v337_v6 }
 0x133   : > { %v339_v10 = vmul.f32 %v338_v7, %v320_v59 }
 0x135   : > { %v341_v13 = vsel %vm340_vm5, %v320_v59, %v339_v10 }
 0x136   : > { %v344_v14 = vsel %vm342_vm6, %v343_v11, %v341_v13 }
 0x137   : > { %v348_v15 = vrot.slane %v344_v14, 1 }
 0x139   : > { %352 = vrot.lane.b32.xlu1 %v348_v15, %s837_s21  ;;  %v349_v17 = vsel %vm287_vm0, %v347_v16, %v348_v15 }
 0x13a   : > { %350 = vrot.lane.b32.xlu0 %v349_v17, %s837_s21 }
 0x142   : > { %449 = vrot.lane.b32.xlu0 %v448_v18, %s839_s28 }
 0x1ab   : > { %v353_v19 = vpop.permute.xlu1 %352 }
 0x1ac   : > { %v359_v20 = vsel %vm358_vm7, %v353_v19, 0.0  ;;  %v351_v21 = vpop.permute.xlu0 %350 }
 0x1ad   : > { %v357_v22 = vsel %vm356_vm8, %v351_v21, 0.0 }
 0x1ae   : > { %v360_v23 = vadd.f32 %v359_v20, %v357_v22 }
 0x1b0   : > { %361 = vadd.xlane.f32.xlu2 %v360_v23 }
 0x1b4   : > { %v450_v24 = vpop.permute.xlu0 %449 }
 0x1b5   : > { %v452_v25 = vsub.f32 %v284_v54, %v450_v24 }
 0x1b7   : > { %454 = vrot.lane.b32.xlu1 %v452_v25, %s837_s21 }
 0x223   : > { %v362_v26 = vpop.xlane.xlu2 %361 }
 0x224   : > { %v363_v27 = vrot.slane %v362_v26, 4 }
 0x226   : > { %v364_v28 = vadd.f32 %v363_v27, %v362_v26 }
 0x228   : > { %v365_v29 = vrot.slane %v364_v28, 2 }
 0x229   : > { %v455_v30 = vpop.permute.xlu1 %454 }
 0x22a   : > { %v366_v31 = vadd.f32 %v365_v29, %v364_v28 }
 0x22c   : > { %v367_v32 = vrot.slane %v366_v31, 1 }
 0x22e   : > { %v368_v33 = vadd.f32 %v367_v32, %v366_v31 }
 0x230   : > { %608 = vpush %v368_v33 }
 0x261   : > { %s609_s3 = spop %608 }
 0x262   : > { %v371_v34 = vstv %s609_s3 }
 0x263   : > { %373 = vst [vmem:[%s225_s20] sm:$0xff] %v371_v34 }
 0x264   : > { %774 = shalt.err (!%p771_p13)
}
 0x265   : > { %614 = dma.vmem_to_hbm [thread:$0]  (%p906_p9), %s474_s29, 128, %s476_s30, %s461_s5  }
 0x266 PF: > { %s487_s4 = sand.u32 1, %s813_s9   ;;  %p624_p0 = pnand %p586_p12, %p913_p11 }
 0x267   : > { %s488_s28 = scalar_lea.sflag [#allocation5], %s487_s4 }
 0x268   : > { %p625_p1 = pneg %p624_p0 }
 0x26a   : > { %808 = dma.done.wait (%p625_p1), %s488_s28, 128  }
 0x26b   : > { %810 = vsyncadd (%p625_p1), %s488_s28, 4294967168  ;;  %s21_s14 = sadd.s32 1, %s833_s14   ;;  %s1015_s9 = smov %s817_s10 }
 0x26c   : > { %p18_p2 = scmp.ge.s32.totalorder %s21_s14, 4   ;;  %s1016_s10 = smov %s821_s11 }
 0x26d   : > { %s1017_s11 = smov %s911_s23  ;;  %s1018_s12 = smov %s829_s13 }
 0x26e   : > { %s1019_s13 = smov %s1021_s17  ;;  %20 = sbr.rel (!%p18_p2) target bundleno = 8 (0x8), region = 98 }
 0x273   :  { %494 = vsyncpa [#allocation4], 1 }
 0x274   :  { %496 = vsyncpa [#allocation4 + $0x1], 1 }
 0x275   :  { %497 = vsyncpa [#allocation7], 1 }
 0x276   :  { %499 = vsyncpa [#allocation7 + $0x1], 1 }
 0x277   :  { %500 = vsyncpa [#allocation5], 1 }
 0x278   :  { %502 = vsyncpa [#allocation5 + $0x1], 1 }

</bundles_post_ra>
